<compile_context>
chip_gen: v5e
topology: v5e:2x2
jax: 0.10.0
libtpu: 0.0.40
codegen_flags: <defaults>
</compile_context>

<pallas_src>
import functools

import jax
import jax.numpy as jnp
from jax.experimental import pallas as pl
from jax.experimental.pallas import tpu as pltpu


# ----------------------------- kernel ---------------------------------------------------------------

def swish_kernel(x_ref, o_ref):
    x = x_ref[...].astype(jnp.float32)           # [tm, lanes], f32 math (v5e has no bf16 VPU/EUP)
    e = jnp.exp(-jnp.abs(x))                     # EUP; always in (0, 1], no overflow
    num = jnp.where(x >= 0.0, 1.0, e)            # = exp(min(x, 0)) without a second exp
    sig = num / (1.0 + e)                        # exact division: compute hides under the HBM DMA
    o_ref[...] = (x * sig).astype(o_ref.dtype)


# ----------------------------- wrapper ---------------------------------------------------------------

_TARGET_BLOCK_BYTES = 2 * 1024 * 1024   # 2 MiB block -> (in+out) x 2 buffers = 8 MiB < 16 MiB (v5e scoped VMEM)
_MIN_SPLIT_BYTES = 1 << 20              # above this, force >= 2 grid steps (feed both v7x TensorCores)


def _round_up(a, b):
    return ((a + b - 1) // b) * b


def _pick_lanes(n, preferred=512):
    """Largest 'nice' multiple of 128 that divides n (copy-free path); else fall back to `preferred`."""
    if n % preferred == 0:
        return preferred
    for cand in (2048, 1024, 768, 640, 512, 384, 256, 128):
        if n % cand == 0:
            return cand
    return preferred  # unaligned: pad fallback below


@jax.jit
def swish(x):
    """Elementwise Swish over an arbitrarily-shaped array via a lane-dense tiled Pallas kernel."""
    orig_shape, orig_dtype = x.shape, x.dtype
    n = x.size
    if n == 0:
        return x

    itemsize = jnp.dtype(orig_dtype).itemsize
    sub = max(8, 32 // max(itemsize, 1))          # sublane multiple: 8 (f32), 16 (bf16), 32 (int8/fp8)

    lanes = _pick_lanes(n)
    rows = pl.cdiv(n, lanes)
    pad = rows * lanes - n                        # 0 on the aligned (copy-free) path

    # Row tile targeting ~2 MiB blocks, a multiple of the sublane packing.
    tm = max(sub, (_TARGET_BLOCK_BYTES // (lanes * itemsize)) // sub * sub)
    # v7x: keep >= 2 grid steps for medium/large inputs so both TensorCores get work.
    if rows * lanes * itemsize >= _MIN_SPLIT_BYTES:
        tm = min(tm, max(sub, _round_up(pl.cdiv(rows, 2), sub)))
    if tm >= rows:
        tm = rows                                 # single block; block dim == full array dim is legal

    xf = x.reshape(-1)
    if pad:
        xf = jnp.pad(xf, (0, pad))                # only hit when no multiple of 128 divides n
    x2 = xf.reshape(rows, lanes)

    out2 = pl.pallas_call(
        swish_kernel,
        out_shape=jax.ShapeDtypeStruct((rows, lanes), orig_dtype),
        grid=(pl.cdiv(rows, tm),),                # partial last block handled by Pallas (elementwise only)
        in_specs=[pl.BlockSpec((tm, lanes), lambda i: (i, 0))],
        out_specs=pl.BlockSpec((tm, lanes), lambda i: (i, 0)),
        compiler_params=pltpu.CompilerParams(dimension_semantics=("parallel",)),
        cost_estimate=pl.CostEstimate(
            flops=6 * rows * lanes,
            transcendentals=rows * lanes,
            bytes_accessed=2 * rows * lanes * itemsize,
        ),
    )(x2)

    if pad:
        return out2.reshape(-1)[:n].reshape(orig_shape)
    return out2.reshape(orig_shape)


# ----------------------------- reference & demo -------------------------------------------------------

def swish_ref(x):
    return x * jax.nn.sigmoid(x)


if __name__ == "__main__":
    key = jax.random.PRNGKey(0)
    k1, k2, k3, k4 = jax.random.split(key, 4)

    # Small shape consistent with an elementwise module.
    x_small = jax.random.normal(k1, (2, 4, 16, 16), jnp.float32) * 3.0
    # Larger input so the grid has multiple parallel steps (feeds both v7x TensorCores).
    x_large = jax.random.normal(k2, (8, 64, 32, 128), jnp.float32) * 3.0
    # Unaligned element count (exercises the pad fallback path).
    x_odd = jax.random.normal(k3, (3, 5, 17), jnp.float32) * 3.0
    # bf16 input (exercises dtype-aware tiling; math still done in f32 inside the kernel).
    x_bf16 = (jax.random.normal(k4, (2, 4, 16, 16), jnp.float32) * 3.0).astype(jnp.bfloat16)

    y_small = swish(x_small)
    y_large = swish(x_large)
    y_odd = swish(x_odd)
    y_bf16 = swish(x_bf16)
    jax.block_until_ready((y_small, y_large, y_odd, y_bf16))

    r_small = swish_ref(x_small)
    r_large = swish_ref(x_large)
    r_odd = swish_ref(x_odd)
    r_bf16 = swish_ref(x_bf16)

    assert y_small.shape == x_small.shape and y_small.dtype == x_small.dtype
    assert y_large.shape == x_large.shape and y_large.dtype == x_large.dtype
    assert y_odd.shape == x_odd.shape and y_odd.dtype == x_odd.dtype
    assert y_bf16.shape == x_bf16.shape and y_bf16.dtype == x_bf16.dtype
    assert bool(jnp.all(jnp.isfinite(y_small)))
    assert bool(jnp.all(jnp.isfinite(y_large)))
    assert bool(jnp.all(jnp.isfinite(y_odd)))

    # Exact f32 sigmoid -> tight tolerances.
    assert bool(jnp.allclose(y_small, r_small, rtol=1e-5, atol=1e-6))
    assert bool(jnp.allclose(y_large, r_large, rtol=1e-5, atol=1e-6))
    assert bool(jnp.allclose(y_odd, r_odd, rtol=1e-5, atol=1e-6))
    # bf16: allow a few bf16 ulps (rounding-order differences vs. reference).
    assert bool(jnp.allclose(y_bf16.astype(jnp.float32), r_bf16.astype(jnp.float32),
                             rtol=3e-2, atol=1e-2))

    print("KERNEL_OK")
</pallas_src>

<mosaic_0001>
module attributes {stable_mosaic.version = 11 : i64} {
  func.func @swish_kernel(%arg0: i32, %arg1: memref<4x512xf32, #tpu.memory_space<vmem>>, %arg2: memref<4x512xf32, #tpu.memory_space<vmem>>) attributes {dimension_semantics = [#tpu.dimension_semantics<parallel>], iteration_bounds = array<i64: 1>, scalar_prefetch = 0 : i64, scratch_operands = 0 : i64, tpu.core_type = #tpu.core_type<tc>, window_params = [{transform_indices = @transform_0, window_bounds = array<i64: 4, 512>}, {transform_indices = @transform_1, window_bounds = array<i64: 4, 512>}]} {
    %c0 = arith.constant 0 : index
    %c0_0 = arith.constant 0 : index
    %0 = vector.load %arg1[%c0, %c0_0] : memref<4x512xf32, #tpu.memory_space<vmem>>, vector<4x512xf32>
    %1 = math.absf %0 : vector<4x512xf32>
    %cst = arith.constant 0.000000e+00 : f32
    %2 = vector.broadcast %cst : f32 to vector<4x512xf32>
    %3 = arith.subf %2, %1 : vector<4x512xf32>
    %4 = math.exp %3 : vector<4x512xf32>
    %cst_1 = arith.constant 0.000000e+00 : f32
    %5 = vector.broadcast %cst_1 : f32 to vector<4x512xf32>
    %6 = arith.cmpf oge, %0, %5 : vector<4x512xf32>
    %cst_2 = arith.constant 1.000000e+00 : f32
    %7 = vector.broadcast %cst_2 : f32 to vector<4x512xf32>
    %8 = arith.select %6, %7, %4 : vector<4x512xi1>, vector<4x512xf32>
    %cst_3 = arith.constant 1.000000e+00 : f32
    %9 = vector.broadcast %cst_3 : f32 to vector<4x512xf32>
    %10 = arith.addf %9, %4 : vector<4x512xf32>
    %11 = arith.divf %8, %10 : vector<4x512xf32>
    %12 = arith.mulf %0, %11 : vector<4x512xf32>
    %c0_4 = arith.constant 0 : index
    %c0_5 = arith.constant 0 : index
    %13 = vector.load %arg2[%c0_4, %c0_5] : memref<4x512xf32, #tpu.memory_space<vmem>>, vector<4x512xf32>
    tpu.vector_store %arg2[%c0_4, %c0_5], %12 {strides = array<i32>} : memref<4x512xf32, #tpu.memory_space<vmem>>, vector<4x512xf32>,
    return
  }
  func.func @transform_0(%arg0: i32) -> (i32, i32) {
    %c0_i32 = arith.constant 0 : i32
    %c0_i32_0 = arith.constant 0 : i32
    return %arg0, %c0_i32 : i32, i32
  }
  func.func @transform_1(%arg0: i32) -> (i32, i32) {
    %c0_i32 = arith.constant 0 : i32
    %c0_i32_0 = arith.constant 0 : i32
    return %arg0, %c0_i32 : i32, i32
  }
}

</mosaic_0001>

<bundles_post_ra>
// kernel: swish.1
= control target key start
LH: loop header
LB: loop body
LE: loop exit
PB: predicated region body
PF: predicated region fallthrough
CT: control target
= control target key end

     0   :  { %s92_s0 = inlined_call_operand.vmem [shape: f32[4,512], index: 0, kind: input, shape index: {}]   ;;  %s93_s1 = inlined_call_operand.vmem [shape: f32[4,512], index: 1, kind: output, shape index: {}]  }
   0x1   :  { %v8_v0 = vld [vmem:[%s92_s0] sm:$0xff]  ;;  %v9_v1 = vld [vmem:[%s92_s0 + $0x8] sm:$0xff] }
   0x2   :  { %v10_v2 = vand.u32 2147483647, %v8_v0  ;;  %v11_v3 = vand.u32 2147483647, %v9_v1  ;;  %vm18_vm4 = vcmp.ge.f32.partialorder %v8_v0, 0.0  ;;  %vm19_vm6 = vcmp.ge.f32.partialorder %v9_v1, 0.0 }
   0x4   :  { %v12_v4 = vsub.f32 0.0, %v10_v2  ;;  %v13_v5 = vsub.f32 0.0, %v11_v3 }
   0x6   :  { %v14_v6 = vmul.f32 1.442695, %v12_v4  ;;  %v16_v7 = vmul.f32 1.442695, %v13_v5 }
   0x8   :  { %62 = vpow2.f32 %v14_v6 }
   0x9   :  { %64 = vpow2.f32 %v16_v7 }
   0xe   :  { %v63_v8 = vpop.eup %62 }
   0xf   :  { %v65_v9 = vpop.eup %64  ;;  %v22_v10 = vadd.f32 1.0, %v63_v8  ;;  %v20_v27 = vsel %vm18_vm4, 1.0, %v63_v8 }
  0x10   :  { %v23_v11 = vadd.f32 1.0, %v65_v9  ;;  %v21_v30 = vsel %vm19_vm6, 1.0, %v65_v9 }
  0x11   :  { %66 = vrcp.f32 %v22_v10  ;;  %vm29_vm0 = vweird.f32 %v22_v10  ;;  %v35_v15 = vand.u32 2147483648, %v22_v10  ;;  %v33_v18 = vand.u32 2147483647, %v22_v10 }
  0x12   :  { %68 = vrcp.f32 %v23_v11  ;;  %v50_v19 = vand.u32 2147483648, %v23_v11  ;;  %vm44_vm2 = vweird.f32 %v23_v11  ;;  %v48_v21 = vand.u32 2147483647, %v23_v11 }
  0x13   :  { %v36_v23 = vor.u32 1.1754944e-38, %v35_v15  ;;  %vm34_vm7 = vcmp.eq.f32.partialorder %v33_v18, 8.507059e+37 }
  0x14   :  { %v51_v26 = vor.u32 1.1754944e-38, %v50_v19  ;;  %vm49_vm9 = vcmp.eq.f32.partialorder %v48_v21, 8.507059e+37 }
  0x17   :  { %v67_v12 = vpop.eup %66 }
  0x18   :  { %v69_v13 = vpop.eup %68  ;;  %v25_v14 = vmul.f32 %v67_v12, %v22_v10  ;;  %vm30_vm1 = vweird.f32 %v67_v12 }
  0x19   :  { %v40_v16 = vmul.f32 %v69_v13, %v23_v11  ;;  %vm45_vm3 = vweird.f32 %v69_v13  ;;  %vm31_vm5 = vmor %vm29_vm0, %vm30_vm1 }
  0x1a   :  { %v26_v17 = vsub.f32 1.0, %v25_v14  ;;  %vm46_vm8 = vmor %vm44_vm2, %vm45_vm3 }
  0x1b   :  { %v41_v20 = vsub.f32 1.0, %v40_v16 }
  0x1c   :  { %v27_v22 = vmul.f32 %v67_v12, %v26_v17 }
  0x1d   :  { %v42_v24 = vmul.f32 %v69_v13, %v41_v20 }
  0x1e   :  { %v28_v25 = vadd.f32 %v67_v12, %v27_v22 }
  0x1f   :  { %v43_v28 = vadd.f32 %v69_v13, %v42_v24 }
  0x20   :  { %v32_v29 = vsel %vm31_vm5, %v67_v12, %v28_v25 }
  0x21   :  { %v37_v31 = vsel %vm34_vm7, %v36_v23, %v32_v29  ;;  %v47_v32 = vsel %vm46_vm8, %v69_v13, %v43_v28 }
  0x22   :  { %v38_v33 = vmul.f32 %v37_v31, %v20_v27  ;;  %v52_v34 = vsel %vm49_vm9, %v51_v26, %v47_v32 }
  0x23   :  { %v53_v35 = vmul.f32 %v52_v34, %v21_v30 }
  0x24   :  { %v54_v36 = vmul.f32 %v38_v33, %v8_v0 }
  0x25   :  { %v55_v37 = vmul.f32 %v53_v35, %v9_v1 }
  0x26   :  { %56 = vst [vmem:[%s93_s1] sm:$0xff] %v54_v36 }
  0x27   :  { %57 = vst [vmem:[%s93_s1 + $0x8] sm:$0xff] %v55_v37 }

</bundles_post_ra>
